<compile_context>
chip_gen: v5e
topology: v5e:2x2
jax: 0.10.0
libtpu: 0.0.40
codegen_flags: <defaults>
</compile_context>

<pallas_src>
import jax
import jax.numpy as jnp
from jax import lax
from jax.experimental import pallas as pl
from jax.experimental.pallas import tpu as pltpu

# Small shapes consistent with the module (Conv2d requires 3 input channels).
N, C_IN, H, W = 2, 3, 8, 8
C_OUT, KH, KW = 2, 2, 2
OH, OW = H - KH + 1, W - KW + 1              # stride 1, no padding (PyTorch default)
K = C_IN * KH * KW                           # 12 im2col taps
L = N * H * W                                # 128 flattened (batch-major) input positions
P = (N - 1) * H * W + (OH - 1) * W + OW      # 119 output columns computed in the kernel
                                             # (columns with oh>=OH or ow>=OW are junk and
                                             #  are dropped by the wrapper slice)


def conv_permute_kernel(x_ref, w_ref, b_ref, o_ref, patches_ref):
    # x_ref:       (C_IN, L)   f32 VMEM  - channel-major, batch+spatial flattened (lane-dense)
    # w_ref:       (C_OUT, K)  f32 VMEM  - conv weight, columns ordered (c, kh, kw)
    # b_ref:       (C_OUT, 1)  f32 VMEM
    # o_ref:       (C_OUT, P)  f32 VMEM  - lane-dense output slab (single store)
    # patches_ref: (K, P)      f32 VMEM scratch - im2col matrix
    #
    # im2col: each tap (c, kh, kw) is one static lane-shifted window of the
    # flattened image, built exactly once (shared by both output channels).
    # Flat index is n*H*W + h*W + w; the shift is at most (KH-1)*W + (KW-1) = 9
    # while valid output positions satisfy h*W + w <= (OH-1)*W + (OW-1) = 54,
    # so shifted reads never cross an image boundary.
    for c in range(C_IN):
        for kh in range(KH):
            for kw in range(KW):
                k = (c * KH + kh) * KW + kw
                off = kh * W + kw                        # static lane offset, 0..9
                patches_ref[k, :] = x_ref[c, off:off + P]

    # One MXU matmul replaces the 24 scalar-broadcast FMAs of the old kernel;
    # bias is added once to the final accumulator.
    out = jnp.dot(w_ref[...], patches_ref[...],
                  preferred_element_type=jnp.float32,
                  precision=lax.Precision.HIGHEST)       # (C_OUT, P)
    o_ref[...] = (out + b_ref[...]).astype(o_ref.dtype)  # single lane-dense store


@jax.jit
def model_forward(x, w, b):
    """x: (N, C_IN, H, W); w: (C_OUT, C_IN, KH, KW); b: (C_OUT,) -> (v1, v2)."""
    # Layout plumbing (XLA side): lane-dense kernel operands.
    xw = jnp.transpose(x, (1, 0, 2, 3)).reshape(C_IN, L)     # (3, 128)
    w2d = w.reshape(C_OUT, K)                                # (2, 12)
    b2d = b.reshape(C_OUT, 1)                                # (2, 1)

    # Single un-gridded pallas_call; no grid / pipelining on purpose (launch-bound).
    slab = pl.pallas_call(
        conv_permute_kernel,
        out_shape=jax.ShapeDtypeStruct((C_OUT, P), x.dtype),
        in_specs=[
            pl.BlockSpec(memory_space=pltpu.MemorySpace.VMEM),   # xw
            pl.BlockSpec(memory_space=pltpu.MemorySpace.VMEM),   # w2d
            pl.BlockSpec(memory_space=pltpu.MemorySpace.VMEM),   # b2d
        ],
        out_specs=pl.BlockSpec(memory_space=pltpu.MemorySpace.VMEM),
        scratch_shapes=[pltpu.VMEM((K, P), jnp.float32)],        # im2col scratch
    )(xw, w2d, b2d)                                              # (C_OUT, P)

    # slab[oc, n*H*W + oh*W + ow] == conv(x)[n, oc, oh, ow] for oh < OH, ow < OW.
    y = jnp.pad(slab, ((0, 0), (0, L - P)))                  # (C_OUT, L)
    y = y.reshape(C_OUT, N, H, W)[:, :, :OH, :OW]            # (C_OUT, N, OH, OW)
    v1 = jnp.transpose(y, (1, 0, 2, 3))                      # (N, C_OUT, OH, OW)
    v2 = jnp.transpose(y, (1, 2, 0, 3))                      # (N, OH, C_OUT, OW) == v1.permute([0,2,1,3])
    return v1, v2


if __name__ == "__main__":
    key = jax.random.PRNGKey(0)
    kx, kw_key, kb = jax.random.split(key, 3)

    x = jax.random.normal(kx, (N, C_IN, H, W), dtype=jnp.float32)

    # Deterministic Conv2d-style init: U(-bound, bound), bound = 1/sqrt(fan_in).
    fan_in = C_IN * KH * KW
    bound = 1.0 / (fan_in ** 0.5)
    w = jax.random.uniform(kw_key, (C_OUT, C_IN, KH, KW), jnp.float32, -bound, bound)
    b = jax.random.uniform(kb, (C_OUT,), jnp.float32, -bound, bound)

    v1, v2 = model_forward(x, w, b)
    jax.block_until_ready((v1, v2))

    # Reference check with XLA conv (NCHW / OIHW).
    v1_ref = lax.conv_general_dilated(
        x, w, window_strides=(1, 1), padding="VALID",
        dimension_numbers=("NCHW", "OIHW", "NCHW"),
        precision=lax.Precision.HIGHEST,
    ) + b[None, :, None, None]
    v2_ref = jnp.transpose(v1_ref, (0, 2, 1, 3))

    assert v1.shape == (N, C_OUT, OH, OW)
    assert v2.shape == (N, OH, C_OUT, OW)
    assert jnp.allclose(v1, v1_ref, atol=1e-5, rtol=1e-5)
    assert jnp.allclose(v2, v2_ref, atol=1e-5, rtol=1e-5)

    print("KERNEL_OK")
</pallas_src>

<mosaic_0001>
module attributes {stable_mosaic.version = 11 : i64} {
  func.func @conv_permute_kernel(%arg0: memref<3x128xf32, #tpu.memory_space<vmem>>, %arg1: memref<2x12xf32, #tpu.memory_space<vmem>>, %arg2: memref<2x1xf32, #tpu.memory_space<vmem>>, %arg3: memref<2x119xf32, #tpu.memory_space<vmem>>, %arg4: memref<12x119xf32, #tpu.memory_space<vmem>>) attributes {dimension_semantics = [], scalar_prefetch = 0 : i64, scratch_operands = 1 : i64, tpu.core_type = #tpu.core_type<tc>} {
    %c0 = arith.constant 0 : index
    %c0_0 = arith.constant 0 : index
    %0 = vector.load %arg0[%c0, %c0_0] : memref<3x128xf32, #tpu.memory_space<vmem>>, vector<1x119xf32>
    %1 = vector.shape_cast %0 : vector<1x119xf32> to vector<119xf32>
    %c0_1 = arith.constant 0 : index
    %c0_2 = arith.constant 0 : index
    %2 = vector.load %arg4[%c0_1, %c0_2] : memref<12x119xf32, #tpu.memory_space<vmem>>, vector<1x119xf32>
    %3 = vector.shape_cast %2 : vector<1x119xf32> to vector<119xf32>
    %4 = vector.shape_cast %1 : vector<119xf32> to vector<1x119xf32>
    tpu.vector_store %arg4[%c0_1, %c0_2], %4 {strides = array<i32>} : memref<12x119xf32, #tpu.memory_space<vmem>>, vector<1x119xf32>,
    %c0_3 = arith.constant 0 : index
    %c1 = arith.constant 1 : index
    %5 = vector.load %arg0[%c0_3, %c1] : memref<3x128xf32, #tpu.memory_space<vmem>>, vector<1x119xf32>
    %6 = vector.shape_cast %5 : vector<1x119xf32> to vector<119xf32>
    %c1_4 = arith.constant 1 : index
    %c0_5 = arith.constant 0 : index
    %7 = vector.load %arg4[%c1_4, %c0_5] : memref<12x119xf32, #tpu.memory_space<vmem>>, vector<1x119xf32>
    %8 = vector.shape_cast %7 : vector<1x119xf32> to vector<119xf32>
    %9 = vector.shape_cast %6 : vector<119xf32> to vector<1x119xf32>
    tpu.vector_store %arg4[%c1_4, %c0_5], %9 {strides = array<i32>} : memref<12x119xf32, #tpu.memory_space<vmem>>, vector<1x119xf32>,
    %c0_6 = arith.constant 0 : index
    %c8 = arith.constant 8 : index
    %10 = vector.load %arg0[%c0_6, %c8] : memref<3x128xf32, #tpu.memory_space<vmem>>, vector<1x119xf32>
    %11 = vector.shape_cast %10 : vector<1x119xf32> to vector<119xf32>
    %c2 = arith.constant 2 : index
    %c0_7 = arith.constant 0 : index
    %12 = vector.load %arg4[%c2, %c0_7] : memref<12x119xf32, #tpu.memory_space<vmem>>, vector<1x119xf32>
    %13 = vector.shape_cast %12 : vector<1x119xf32> to vector<119xf32>
    %14 = vector.shape_cast %11 : vector<119xf32> to vector<1x119xf32>
    tpu.vector_store %arg4[%c2, %c0_7], %14 {strides = array<i32>} : memref<12x119xf32, #tpu.memory_space<vmem>>, vector<1x119xf32>,
    %c0_8 = arith.constant 0 : index
    %c9 = arith.constant 9 : index
    %15 = vector.load %arg0[%c0_8, %c9] : memref<3x128xf32, #tpu.memory_space<vmem>>, vector<1x119xf32>
    %16 = vector.shape_cast %15 : vector<1x119xf32> to vector<119xf32>
    %c3 = arith.constant 3 : index
    %c0_9 = arith.constant 0 : index
    %17 = vector.load %arg4[%c3, %c0_9] : memref<12x119xf32, #tpu.memory_space<vmem>>, vector<1x119xf32>
    %18 = vector.shape_cast %17 : vector<1x119xf32> to vector<119xf32>
    %19 = vector.shape_cast %16 : vector<119xf32> to vector<1x119xf32>
    tpu.vector_store %arg4[%c3, %c0_9], %19 {strides = array<i32>} : memref<12x119xf32, #tpu.memory_space<vmem>>, vector<1x119xf32>,
    %c1_10 = arith.constant 1 : index
    %c0_11 = arith.constant 0 : index
    %20 = vector.load %arg0[%c1_10, %c0_11] : memref<3x128xf32, #tpu.memory_space<vmem>>, vector<1x119xf32>
    %21 = vector.shape_cast %20 : vector<1x119xf32> to vector<119xf32>
    %c4 = arith.constant 4 : index
    %c0_12 = arith.constant 0 : index
    %22 = vector.load %arg4[%c4, %c0_12] : memref<12x119xf32, #tpu.memory_space<vmem>>, vector<1x119xf32>
    %23 = vector.shape_cast %22 : vector<1x119xf32> to vector<119xf32>
    %24 = vector.shape_cast %21 : vector<119xf32> to vector<1x119xf32>
    tpu.vector_store %arg4[%c4, %c0_12], %24 {strides = array<i32>} : memref<12x119xf32, #tpu.memory_space<vmem>>, vector<1x119xf32>,
    %c1_13 = arith.constant 1 : index
    %c1_14 = arith.constant 1 : index
    %25 = vector.load %arg0[%c1_13, %c1_14] : memref<3x128xf32, #tpu.memory_space<vmem>>, vector<1x119xf32>
    %26 = vector.shape_cast %25 : vector<1x119xf32> to vector<119xf32>
    %c5 = arith.constant 5 : index
    %c0_15 = arith.constant 0 : index
    %27 = vector.load %arg4[%c5, %c0_15] : memref<12x119xf32, #tpu.memory_space<vmem>>, vector<1x119xf32>
    %28 = vector.shape_cast %27 : vector<1x119xf32> to vector<119xf32>
    %29 = vector.shape_cast %26 : vector<119xf32> to vector<1x119xf32>
    tpu.vector_store %arg4[%c5, %c0_15], %29 {strides = array<i32>} : memref<12x119xf32, #tpu.memory_space<vmem>>, vector<1x119xf32>,
    %c1_16 = arith.constant 1 : index
    %c8_17 = arith.constant 8 : index
    %30 = vector.load %arg0[%c1_16, %c8_17] : memref<3x128xf32, #tpu.memory_space<vmem>>, vector<1x119xf32>
    %31 = vector.shape_cast %30 : vector<1x119xf32> to vector<119xf32>
    %c6 = arith.constant 6 : index
    %c0_18 = arith.constant 0 : index
    %32 = vector.load %arg4[%c6, %c0_18] : memref<12x119xf32, #tpu.memory_space<vmem>>, vector<1x119xf32>
    %33 = vector.shape_cast %32 : vector<1x119xf32> to vector<119xf32>
    %34 = vector.shape_cast %31 : vector<119xf32> to vector<1x119xf32>
    tpu.vector_store %arg4[%c6, %c0_18], %34 {strides = array<i32>} : memref<12x119xf32, #tpu.memory_space<vmem>>, vector<1x119xf32>,
    %c1_19 = arith.constant 1 : index
    %c9_20 = arith.constant 9 : index
    %35 = vector.load %arg0[%c1_19, %c9_20] : memref<3x128xf32, #tpu.memory_space<vmem>>, vector<1x119xf32>
    %36 = vector.shape_cast %35 : vector<1x119xf32> to vector<119xf32>
    %c7 = arith.constant 7 : index
    %c0_21 = arith.constant 0 : index
    %37 = vector.load %arg4[%c7, %c0_21] : memref<12x119xf32, #tpu.memory_space<vmem>>, vector<1x119xf32>
    %38 = vector.shape_cast %37 : vector<1x119xf32> to vector<119xf32>
    %39 = vector.shape_cast %36 : vector<119xf32> to vector<1x119xf32>
    tpu.vector_store %arg4[%c7, %c0_21], %39 {strides = array<i32>} : memref<12x119xf32, #tpu.memory_space<vmem>>, vector<1x119xf32>,
    %c2_22 = arith.constant 2 : index
    %c0_23 = arith.constant 0 : index
    %40 = vector.load %arg0[%c2_22, %c0_23] : memref<3x128xf32, #tpu.memory_space<vmem>>, vector<1x119xf32>
    %41 = vector.shape_cast %40 : vector<1x119xf32> to vector<119xf32>
    %c8_24 = arith.constant 8 : index
    %c0_25 = arith.constant 0 : index
    %42 = vector.load %arg4[%c8_24, %c0_25] : memref<12x119xf32, #tpu.memory_space<vmem>>, vector<1x119xf32>
    %43 = vector.shape_cast %42 : vector<1x119xf32> to vector<119xf32>
    %44 = vector.shape_cast %41 : vector<119xf32> to vector<1x119xf32>
    tpu.vector_store %arg4[%c8_24, %c0_25], %44 {strides = array<i32>} : memref<12x119xf32, #tpu.memory_space<vmem>>, vector<1x119xf32>,
    %c2_26 = arith.constant 2 : index
    %c1_27 = arith.constant 1 : index
    %45 = vector.load %arg0[%c2_26, %c1_27] : memref<3x128xf32, #tpu.memory_space<vmem>>, vector<1x119xf32>
    %46 = vector.shape_cast %45 : vector<1x119xf32> to vector<119xf32>
    %c9_28 = arith.constant 9 : index
    %c0_29 = arith.constant 0 : index
    %47 = vector.load %arg4[%c9_28, %c0_29] : memref<12x119xf32, #tpu.memory_space<vmem>>, vector<1x119xf32>
    %48 = vector.shape_cast %47 : vector<1x119xf32> to vector<119xf32>
    %49 = vector.shape_cast %46 : vector<119xf32> to vector<1x119xf32>
    tpu.vector_store %arg4[%c9_28, %c0_29], %49 {strides = array<i32>} : memref<12x119xf32, #tpu.memory_space<vmem>>, vector<1x119xf32>,
    %c2_30 = arith.constant 2 : index
    %c8_31 = arith.constant 8 : index
    %50 = vector.load %arg0[%c2_30, %c8_31] : memref<3x128xf32, #tpu.memory_space<vmem>>, vector<1x119xf32>
    %51 = vector.shape_cast %50 : vector<1x119xf32> to vector<119xf32>
    %c10 = arith.constant 10 : index
    %c0_32 = arith.constant 0 : index
    %52 = vector.load %arg4[%c10, %c0_32] : memref<12x119xf32, #tpu.memory_space<vmem>>, vector<1x119xf32>
    %53 = vector.shape_cast %52 : vector<1x119xf32> to vector<119xf32>
    %54 = vector.shape_cast %51 : vector<119xf32> to vector<1x119xf32>
    tpu.vector_store %arg4[%c10, %c0_32], %54 {strides = array<i32>} : memref<12x119xf32, #tpu.memory_space<vmem>>, vector<1x119xf32>,
    %c2_33 = arith.constant 2 : index
    %c9_34 = arith.constant 9 : index
    %55 = vector.load %arg0[%c2_33, %c9_34] : memref<3x128xf32, #tpu.memory_space<vmem>>, vector<1x119xf32>
    %56 = vector.shape_cast %55 : vector<1x119xf32> to vector<119xf32>
    %c11 = arith.constant 11 : index
    %c0_35 = arith.constant 0 : index
    %57 = vector.load %arg4[%c11, %c0_35] : memref<12x119xf32, #tpu.memory_space<vmem>>, vector<1x119xf32>
    %58 = vector.shape_cast %57 : vector<1x119xf32> to vector<119xf32>
    %59 = vector.shape_cast %56 : vector<119xf32> to vector<1x119xf32>
    tpu.vector_store %arg4[%c11, %c0_35], %59 {strides = array<i32>} : memref<12x119xf32, #tpu.memory_space<vmem>>, vector<1x119xf32>,
    %c0_36 = arith.constant 0 : index
    %c0_37 = arith.constant 0 : index
    %60 = vector.load %arg1[%c0_36, %c0_37] : memref<2x12xf32, #tpu.memory_space<vmem>>, vector<2x12xf32>
    %c0_38 = arith.constant 0 : index
    %c0_39 = arith.constant 0 : index
    %61 = vector.load %arg4[%c0_38, %c0_39] : memref<12x119xf32, #tpu.memory_space<vmem>>, vector<12x119xf32>
    %cst = arith.constant dense<0.000000e+00> : vector<2x119xf32>
    %62 = tpu.matmul %60, %61, %cst {dimension_numbers = #tpu.dot_dimension_numbers<[1], [0], [0], [1], [0, 0, 1, 1], [], []>, precision = #tpu.contract_precision<fp32>} : vector<2x12xf32>, vector<12x119xf32>, vector<2x119xf32> -> vector<2x119xf32>
    %c0_40 = arith.constant 0 : index
    %c0_41 = arith.constant 0 : index
    %63 = vector.load %arg2[%c0_40, %c0_41] : memref<2x1xf32, #tpu.memory_space<vmem>>, vector<2x1xf32>
    %64 = vector.broadcast %63 : vector<2x1xf32> to vector<2x119xf32>
    %65 = arith.addf %62, %64 : vector<2x119xf32>
    %c0_42 = arith.constant 0 : index
    %c0_43 = arith.constant 0 : index
    %66 = vector.load %arg3[%c0_42, %c0_43] : memref<2x119xf32, #tpu.memory_space<vmem>>, vector<2x119xf32>
    tpu.vector_store %arg3[%c0_42, %c0_43], %65 {strides = array<i32>} : memref<2x119xf32, #tpu.memory_space<vmem>>, vector<2x119xf32>,
    return
  }
}

</mosaic_0001>

<bundles_post_ra>
// kernel: model_forward.1
= control target key start
LH: loop header
LB: loop body
LE: loop exit
PB: predicated region body
PF: predicated region fallthrough
CT: control target
= control target key end

     0   :  { %s262_s16 = smov 119   ;;  %s263_s17 = smov 127   ;;  %vm15_vm0 = vcmask 966656   ;;  %vm84_vm1 = vcmask 97280   ;;  %v265_v21 = vmov 0   ;;  %vm88_vm2 = vcmask 1043456   ;;  %s343_s0 = inlined_call_operand.vmem [shape: f32[3,128], index: 0, kind: input, shape index: {}]   ;;  %s344_s1 = inlined_call_operand.vmem [shape: f32[2,12], index: 1, kind: input, shape index: {}]   ;;  %s345_s2 = inlined_call_operand.vmem [shape: f32[2,1], index: 2, kind: input, shape index: {}]   ;;  %s346_s3 = inlined_call_operand.vmem [shape: f32[2,119], index: 3, kind: output, shape index: {}]  }
   0x1   :  { %v69_v0 = vld [vmem:[%s343_s0 + $0x2] sm:$0x1]  ;;  %v23_v2 = vld [vmem:[%s343_s0] sm:$0x1]  ;;  %s264_s20 = smov 120   ;;  %261 = vset.pattern.permute.xlu0 %v265_v21  ;;  %vm251_vm3 = vcmask 967680  }
   0x2   :  { %v57_v1 = vld [vmem:[%s343_s0 + $0x2] sm:$0x1]  ;;  %71 = vrot.lane.b32.xlu1 %v69_v0, %s262_s16  ;;  %25 = vrot.lane.b32.xlu2 %v23_v2, %s264_s20  ;;  %v17_v4 = vld [vmem:[%s343_s0] sm:$0x1] }
   0x3   :  { %59 = vrot.lane.b32.xlu0 %v57_v1, %s263_s17  ;;  %v63_v3 = vld [vmem:[%s343_s0 + $0x2] sm:$0x1]  ;;  %v29_v5 = vld [vmem:[%s343_s0] sm:$0x1]  ;;  %v37_v6 = vld [vmem:[%s343_s0 + $0x1] sm:$0x1] }
   0x4   :  { %v43_v7 = vld [vmem:[%s343_s0 + $0x1] sm:$0x1]  ;;  %v55_v9 = vld [vmem:[%s343_s0 + $0x2] sm:$0x1]  ;;  %v14_v11 = vld [vmem:[%s343_s0] sm:$0x1] }
   0x5   :  { %v49_v8 = vld [vmem:[%s343_s0 + $0x1] sm:$0x1]  ;;  %56 = vst.msk [vmem:[#allocation2 + $0x8] sm:$0x1] %vm15_vm0, %v55_v9 }
   0x6   :  { %v35_v12 = vld [vmem:[%s343_s0 + $0x1] sm:$0x1]  ;;  %16 = vst.msk [vmem:[#allocation2] sm:$0x1] %vm15_vm0, %v14_v11 }
   0x7   :  { %36 = vst.msk [vmem:[#allocation2 + $0x4] sm:$0x1] %vm15_vm0, %v35_v12  ;;  %v75_v17 = vld [vmem:[%s344_s1] sm:$0x3] }
   0x8   :  { %v86_v18 = vsel %vm84_vm1, %v75_v17, 0  ;;  %v78_v23 = vld [vmem:[%s345_s2] sm:$0x3] }
   0x9   :  { %v110_v22 = vand.u32 4294901760, %v86_v18 }
   0xa   :  { %19 = vrot.lane.b32.xlu1 %v17_v4, %s263_s17  ;;  %31 = vrot.lane.b32.xlu2 %v29_v5, %s262_s16 }
   0xb   :  { %65 = vrot.lane.b32.xlu0 %v63_v3, %s264_s20  ;;  %v111_v24 = vsub.f32 %v86_v18, %v110_v22 }
   0xd   :  { %v112_v30 = vand.u32 4294901760, %v111_v24 }
   0xf   :  { %v113_v33 = vsub.f32 %v111_v24, %v112_v30 }
  0x11   :  { %v114_v38 = vand.u32 4294901760, %v113_v33 }
  0x12   :  { %45 = vrot.lane.b32.xlu1 %v43_v7, %s264_s20  ;;  %51 = vrot.lane.b32.xlu2 %v49_v8, %s262_s16 }
  0x13   :  { %39 = vrot.lane.b32.xlu0 %v37_v6, %s263_s17 }
  0x1b   :  { %81 = vperm.xlu0 %261, %v78_v23  }
  0x5c   :  { %v26_v10 = vpop.permute.xlu2 %25 }
  0x5d   :  { %28 = vst.msk [vmem:[#allocation2 + $0x2] sm:$0x1] %vm15_vm0, %v26_v10 }
  0x64   :  { %v32_v13 = vpop.permute.xlu2 %31 }
  0x65   :  { %34 = vst.msk [vmem:[#allocation2 + $0x3] sm:$0x1] %vm15_vm0, %v32_v13 }
  0x6c   :  { %v52_v14 = vpop.permute.xlu2 %51 }
  0x6d   :  { %54 = vst.msk [vmem:[#allocation2 + $0x7] sm:$0x1] %vm15_vm0, %v52_v14 }
  0x74   :  { %v72_v15 = vpop.permute.xlu1 %71 }
  0x75   :  { %v60_v16 = vpop.permute.xlu0 %59  ;;  %74 = vst.msk [vmem:[#allocation2 + $0xb] sm:$0x1] %vm15_vm0, %v72_v15 }
  0x76   :  { %62 = vst.msk [vmem:[#allocation2 + $0x9] sm:$0x1] %vm15_vm0, %v60_v16 }
  0x7c   :  { %v20_v20 = vpop.permute.xlu1 %19 }
  0x7d   :  { %v66_v19 = vpop.permute.xlu0 %65  ;;  %22 = vst.msk [vmem:[#allocation2 + $0x1] sm:$0x1] %vm15_vm0, %v20_v20 }
  0x7e   :  { %68 = vst.msk [vmem:[#allocation2 + $0xa] sm:$0x1] %vm15_vm0, %v66_v19 }
  0x84   :  { %v46_v26 = vpop.permute.xlu1 %45 }
  0x85   :  { %v40_v25 = vpop.permute.xlu0 %39  ;;  %v77_v27 = vld [vmem:[#allocation2 + $0x8] sm:$0xf]  ;;  %48 = vst.msk [vmem:[#allocation2 + $0x6] sm:$0x1] %vm15_vm0, %v46_v26 }
  0x86   :  { %42 = vst.msk [vmem:[#allocation2 + $0x5] sm:$0x1] %vm15_vm0, %v40_v25  ;;  %v90_v28 = vsel %vm88_vm2, %v77_v27, 0 }
  0x87   :  { %v106_v29 = vand.u32 4294901760, %v90_v28 }
  0x89   :  { %107 = vmatpush.msra.mxu0 %v106_v29  ;;  %191 = vmatpush.msra.mxu3 %v106_v29  ;;  %v134_v31 = vsub.f32 %v90_v28, %v106_v29 }
  0x8b   :  { %166 = vmatpush.msra.mxu2 %v134_v31  ;;  %v135_v32 = vand.u32 4294901760, %v134_v31 }
  0x8d   :  { %v136_v34 = vsub.f32 %v134_v31, %v135_v32  ;;  %v76_v35 = vld [vmem:[#allocation2] sm:$0xff]  ;;  %v82_v43 = vpop.permute.xlu0 %81 }
  0x8e   :  { %v108_v36 = vand.u32 4294901760, %v76_v35 }
  0x8f   :  { %v137_v37 = vand.u32 4294901760, %v136_v34 }
  0x90   :  { %109 = vmatpush.msra.mxu0 %v108_v36  ;;  %193 = vmatpush.msra.mxu3 %v108_v36  ;;  %v140_v39 = vsub.f32 %v76_v35, %v108_v36 }
  0x91   :  { %138 = vmatpush.msra.mxu1 %v137_v37  ;;  %115 = vmatmul.f32.vlgmr.msra.gmra.mxu0 %v114_v38 }
  0x92   :  { %218 = vmatpush.msrb.mxu0 %v135_v32  ;;  %169 = vmatpush.msra.mxu2 %v140_v39  ;;  %v141_v40 = vand.u32 4294901760, %v140_v39 }
  0x93   :  { %172 = vmatmul.f32.vlgmr.msra.gmra.mxu2 %v111_v24  ;;  %197 = vmatmul.f32.vlgmr.msra.gmra.mxu3 %v112_v30 }
  0x94   :  { %222 = vmatpush.msrb.mxu0 %v141_v40  ;;  %v142_v41 = vsub.f32 %v140_v39, %v141_v40 }
  0x96   :  { %v143_v42 = vand.u32 4294901760, %v142_v41 }
  0x98   :  { %144 = vmatpush.msra.mxu1 %v143_v42 }
  0x99   :  { %146 = vmatmul.f32.vlgmr.msra.gmra.mxu1 %v110_v22  ;;  %224 = vmatmul.f32.vlgmr.msrb.gmra.mxu0 %v110_v22 }
  0x9a   :  { %243 = vmatpush.msrb.mxu1 %v106_v29 }
  0x9c   :  { %245 = vmatpush.msrb.mxu1 %v108_v36 }
  0xa1   :  { %247 = vmatmul.f32.vlgmr.msrb.gmra.mxu1 %v110_v22 }
 0x10e   :  { %v116_v44 = vpop.f32.mrf.mxu0 }
 0x10f   :  { %v117_v45 = vadd.f32 %v116_v44, %v82_v43 }
 0x116   :  { %v147_v46 = vpop.f32.mrf.mxu1  ;;  %v173_v47 = vpop.f32.mrf.mxu2 }
 0x117   :  { %v148_v48 = vadd.f32 %v147_v46, %v117_v45  ;;  %v198_v49 = vpop.f32.mrf.mxu3  ;;  %v225_v51 = vpop.f32.mrf.mxu0 }
 0x119   :  { %v174_v50 = vadd.f32 %v173_v47, %v148_v48 }
 0x11b   :  { %v199_v52 = vadd.f32 %v198_v49, %v174_v50 }
 0x11d   :  { %v226_v53 = vadd.f32 %v225_v51, %v199_v52 }
 0x11e   :  { %v248_v54 = vpop.f32.mrf.mxu1 }
 0x11f   :  { %v249_v55 = vadd.f32 %v248_v54, %v226_v53 }
 0x121   :  { %252 = vst.msk [vmem:[%s346_s3] sm:$0x3] %vm251_vm3, %v249_v55 }

</bundles_post_ra>
